<compile_context>
chip_gen: v6e
topology: v6e:2x2x1
jax: 0.10.0
libtpu: 0.0.40
codegen_flags: <defaults>
</compile_context>

<pallas_src>
import jax
import jax.numpy as jnp
from jax.experimental import pallas as pl
from jax.experimental.pallas import tpu as pltpu


def _round_up(x, m):
    return (x + m - 1) // m * m


# ---------------------------------------------------------------------------
# Pallas kernel: fused 2-layer MLP   out = relu(relu(x @ W1^T + b1) @ W2^T + b2)
# ---------------------------------------------------------------------------

def cfmlp_kernel(x_ref, w1t_ref, b1_ref, w2t_ref, b2_ref, out_ref):
    x = x_ref[...]
    h = jnp.dot(x, w1t_ref[...], preferred_element_type=jnp.float32) + b1_ref[...]
    h = jnp.maximum(h, 0.0)
    o = jnp.dot(h, w2t_ref[...], preferred_element_type=jnp.float32) + b2_ref[...]
    out_ref[...] = jnp.maximum(o, 0.0).astype(out_ref.dtype)


def cfmlp_forward(params, embd, *, tm=128):
    """embd: (B, sum(layers)*2) -> (B, embedSize)."""
    w1, b1 = params["w1"], params["b1"]   # (H, Din), (H,)   torch Linear layout
    w2, b2 = params["w2"], params["b2"]   # (Dout, H), (Dout,)
    B, Din = embd.shape
    H = w1.shape[0]
    Dout = w2.shape[0]

    # Lane-dense padded sizes (multiples of 128) and row-tile-aligned batch.
    Dp_in = _round_up(Din, 128)
    Hp = _round_up(H, 128)
    Dp_out = _round_up(Dout, 128)
    Bp = _round_up(B, tm)

    # Glue: zero-pad operands + pre-transpose weights.  Zero padding is exact:
    # padded input columns hit zero weight rows, padded hidden/output columns
    # get 0 bias -> relu(0) = 0, and are sliced off below.
    xp = jnp.zeros((Bp, Dp_in), jnp.float32).at[:B, :Din].set(embd)
    w1tp = jnp.zeros((Dp_in, Hp), jnp.float32).at[:Din, :H].set(w1.T)
    b1p = jnp.zeros((1, Hp), jnp.float32).at[0, :H].set(b1)
    w2tp = jnp.zeros((Hp, Dp_out), jnp.float32).at[:H, :Dout].set(w2.T)
    b2p = jnp.zeros((1, Dp_out), jnp.float32).at[0, :Dout].set(b2)

    grid = (Bp // tm,)
    out = pl.pallas_call(
        cfmlp_kernel,
        out_shape=jax.ShapeDtypeStruct((Bp, Dp_out), jnp.float32),
        grid=grid,
        in_specs=[
            pl.BlockSpec((tm, Dp_in), lambda i: (i, 0)),      # x row tile
            pl.BlockSpec((Dp_in, Hp), lambda i: (0, 0)),      # W1^T resident
            pl.BlockSpec((1, Hp), lambda i: (0, 0)),          # b1 resident
            pl.BlockSpec((Hp, Dp_out), lambda i: (0, 0)),     # W2^T resident
            pl.BlockSpec((1, Dp_out), lambda i: (0, 0)),      # b2 resident
        ],
        out_specs=pl.BlockSpec((tm, Dp_out), lambda i: (i, 0)),
        compiler_params=pltpu.CompilerParams(
            dimension_semantics=("parallel",)),               # shard rows over TCs
    )(xp, w1tp, b1p, w2tp, b2p)

    return out[:B, :Dout]


# ---------------------------------------------------------------------------
# Deterministic parameter / input construction + self-check
# ---------------------------------------------------------------------------

def xavier_uniform(key, out_f, in_f):
    bound = (6.0 / (in_f + out_f)) ** 0.5
    return jax.random.uniform(key, (out_f, in_f), jnp.float32, -bound, bound)


if __name__ == "__main__":
    embed_size = 32
    layers = [32, 32, 16]          # sum(layers) = 80
    d_in = sum(layers) * 2         # 160  (transForm1 in_features)
    d_hid = sum(layers)            # 80   (transForm1 out / transForm2 in)
    batch = 256

    root = jax.random.PRNGKey(0)
    k1, k2, kx = jax.random.split(root, 3)

    params = {
        "w1": xavier_uniform(k1, d_hid, d_in),
        "b1": jnp.zeros((d_hid,), jnp.float32),     # bias zeroed as in _init_weight_
        "w2": xavier_uniform(k2, embed_size, d_hid),
        "b2": jnp.zeros((embed_size,), jnp.float32),
    }

    x = jax.random.normal(kx, (batch, d_in), jnp.float32)

    out = cfmlp_forward(params, x)
    jax.block_until_ready(out)

    # Pure-JAX reference with identical semantics to the PyTorch forward.
    ref = jnp.maximum(x @ params["w1"].T + params["b1"], 0.0)
    ref = jnp.maximum(ref @ params["w2"].T + params["b2"], 0.0)

    assert out.shape == (batch, embed_size) and out.dtype == jnp.float32
    assert jnp.allclose(out, ref, atol=1e-5, rtol=1e-5)
    print("KERNEL_OK")
</pallas_src>

<mosaic_0001>
module attributes {stable_mosaic.version = 11 : i64} {
  func.func @cfmlp_kernel(%arg0: i32, %arg1: memref<128x256xf32, #tpu.memory_space<vmem>>, %arg2: memref<256x128xf32, #tpu.memory_space<vmem>>, %arg3: memref<1x128xf32, #tpu.memory_space<vmem>>, %arg4: memref<128x128xf32, #tpu.memory_space<vmem>>, %arg5: memref<1x128xf32, #tpu.memory_space<vmem>>, %arg6: memref<128x128xf32, #tpu.memory_space<vmem>>) attributes {dimension_semantics = [#tpu.dimension_semantics<parallel>], iteration_bounds = array<i64: 2>, scalar_prefetch = 0 : i64, scratch_operands = 0 : i64, tpu.core_type = #tpu.core_type<tc>, window_params = [{transform_indices = @transform_0, window_bounds = array<i64: 128, 256>}, {pipeline_mode = #tpu.pipeline_mode<synchronous>, transform_indices = @transform_1, window_bounds = array<i64: 256, 128>}, {pipeline_mode = #tpu.pipeline_mode<synchronous>, transform_indices = @transform_2, window_bounds = array<i64: 1, 128>}, {pipeline_mode = #tpu.pipeline_mode<synchronous>, transform_indices = @transform_3, window_bounds = array<i64: 128, 128>}, {pipeline_mode = #tpu.pipeline_mode<synchronous>, transform_indices = @transform_4, window_bounds = array<i64: 1, 128>}, {transform_indices = @transform_5, window_bounds = array<i64: 128, 128>}]} {
    %c0 = arith.constant 0 : index
    %c0_0 = arith.constant 0 : index
    %0 = vector.load %arg1[%c0, %c0_0] : memref<128x256xf32, #tpu.memory_space<vmem>>, vector<128x256xf32>
    %c0_1 = arith.constant 0 : index
    %c0_2 = arith.constant 0 : index
    %1 = vector.load %arg2[%c0_1, %c0_2] : memref<256x128xf32, #tpu.memory_space<vmem>>, vector<256x128xf32>
    %cst = arith.constant dense<0.000000e+00> : vector<128x128xf32>
    %2 = tpu.matmul %0, %1, %cst {dimension_numbers = #tpu.dot_dimension_numbers<[1], [0], [0], [1], [0, 0, 1, 1], [], []>} : vector<128x256xf32>, vector<256x128xf32>, vector<128x128xf32> -> vector<128x128xf32>
    %c0_3 = arith.constant 0 : index
    %c0_4 = arith.constant 0 : index
    %3 = vector.load %arg3[%c0_3, %c0_4] : memref<1x128xf32, #tpu.memory_space<vmem>>, vector<1x128xf32>
    %4 = vector.broadcast %3 : vector<1x128xf32> to vector<128x128xf32>
    %5 = arith.addf %2, %4 : vector<128x128xf32>
    %cst_5 = arith.constant 0.000000e+00 : f32
    %6 = vector.broadcast %cst_5 : f32 to vector<128x128xf32>
    %7 = arith.maximumf %5, %6 : vector<128x128xf32>
    %c0_6 = arith.constant 0 : index
    %c0_7 = arith.constant 0 : index
    %8 = vector.load %arg4[%c0_6, %c0_7] : memref<128x128xf32, #tpu.memory_space<vmem>>, vector<128x128xf32>
    %cst_8 = arith.constant dense<0.000000e+00> : vector<128x128xf32>
    %9 = tpu.matmul %7, %8, %cst_8 {dimension_numbers = #tpu.dot_dimension_numbers<[1], [0], [0], [1], [0, 0, 1, 1], [], []>} : vector<128x128xf32>, vector<128x128xf32>, vector<128x128xf32> -> vector<128x128xf32>
    %c0_9 = arith.constant 0 : index
    %c0_10 = arith.constant 0 : index
    %10 = vector.load %arg5[%c0_9, %c0_10] : memref<1x128xf32, #tpu.memory_space<vmem>>, vector<1x128xf32>
    %11 = vector.broadcast %10 : vector<1x128xf32> to vector<128x128xf32>
    %12 = arith.addf %9, %11 : vector<128x128xf32>
    %cst_11 = arith.constant 0.000000e+00 : f32
    %13 = vector.broadcast %cst_11 : f32 to vector<128x128xf32>
    %14 = arith.maximumf %12, %13 : vector<128x128xf32>
    %c0_12 = arith.constant 0 : index
    %c0_13 = arith.constant 0 : index
    %15 = vector.load %arg6[%c0_12, %c0_13] : memref<128x128xf32, #tpu.memory_space<vmem>>, vector<128x128xf32>
    tpu.vector_store %arg6[%c0_12, %c0_13], %14 {strides = array<i32>} : memref<128x128xf32, #tpu.memory_space<vmem>>, vector<128x128xf32>,
    return
  }
  func.func @transform_0(%arg0: i32) -> (i32, i32) {
    %c0_i32 = arith.constant 0 : i32
    %c0_i32_0 = arith.constant 0 : i32
    return %arg0, %c0_i32 : i32, i32
  }
  func.func @transform_1(%arg0: i32) -> (i32, i32) {
    %c0_i32 = arith.constant 0 : i32
    %c0_i32_0 = arith.constant 0 : i32
    %c0_i32_1 = arith.constant 0 : i32
    return %c0_i32, %c0_i32_0 : i32, i32
  }
  func.func @transform_2(%arg0: i32) -> (i32, i32) {
    %c0_i32 = arith.constant 0 : i32
    %c0_i32_0 = arith.constant 0 : i32
    %c0_i32_1 = arith.constant 0 : i32
    return %c0_i32, %c0_i32_0 : i32, i32
  }
  func.func @transform_3(%arg0: i32) -> (i32, i32) {
    %c0_i32 = arith.constant 0 : i32
    %c0_i32_0 = arith.constant 0 : i32
    %c0_i32_1 = arith.constant 0 : i32
    return %c0_i32, %c0_i32_0 : i32, i32
  }
  func.func @transform_4(%arg0: i32) -> (i32, i32) {
    %c0_i32 = arith.constant 0 : i32
    %c0_i32_0 = arith.constant 0 : i32
    %c0_i32_1 = arith.constant 0 : i32
    return %c0_i32, %c0_i32_0 : i32, i32
  }
  func.func @transform_5(%arg0: i32) -> (i32, i32) {
    %c0_i32 = arith.constant 0 : i32
    %c0_i32_0 = arith.constant 0 : i32
    return %arg0, %c0_i32 : i32, i32
  }
}

</mosaic_0001>

<bundles_post_ra>
// kernel: tpu_custom_call.1
= control target key start
LH: loop header
LB: loop body
LE: loop exit
PB: predicated region body
PF: predicated region fallthrough
CT: control target
= control target key end

     0   :  { %10 = vsyncpa [#allocation3], 0  ;;  %s1552_s0 = inlined_call_operand.hbm [shape: f32[256,256], index: 0, kind: input, shape index: {}]   ;;  %s1553_s1 = inlined_call_operand.hbm [shape: f32[256,128], index: 1, kind: input, shape index: {}]   ;;  %s1554_s2 = inlined_call_operand.vmem [shape: f32[1,128], index: 2, kind: input, shape index: {}]   ;;  %s1555_s3 = inlined_call_operand.hbm [shape: f32[128,128], index: 3, kind: input, shape index: {}]   ;;  %s1556_s4 = inlined_call_operand.vmem [shape: f32[1,128], index: 4, kind: input, shape index: {}]   ;;  %s1557_s5 = inlined_call_operand.hbm [shape: f32[256,128], index: 5, kind: output, shape index: {}]  }
   0x1   :  { %12 = vsyncpa [#allocation3 + $0x1], 0 }
   0x2   :  { %13 = vsyncpa [#allocation6], 0 }
   0x3   :  { %14 = vsyncpa [#allocation4], 0 }
   0x4   :  { %16 = vsyncpa [#allocation4 + $0x1], 0  ;;  %s1268_s18 = smov 0   ;;  %s1270_s19 = smov 0  }
   0x5   :  { %s1272_s20 = smov 0   ;;  %s1274_s21 = smov 0  }
   0x6 LB: > { %s1289_s22 = sadd.s32 4294967295, %s1226_s21   ;;  %s813_s23 = sadd.s32 4294967294, %s1226_s21   ;;  %s1226_s21 = sphi %s1274_s21, %s1579_s21   ;;  %s1222_s20 = sphi %s1272_s20, %s1578_s20   ;;  %s1218_s19 = sphi %s1270_s19, %s1577_s19   ;;  %s1214_s18 = sphi %s1268_s18, %s1576_s18  }
   0x7   : > { %p42_p0 = scmp.ne.s32.totalorder %s1218_s19, %s1214_s18  ;;  %p1558_p1 = scmp.eq.s32.totalorder %s1289_s22, 0 }
   0x8   : > { %p156_p3 = scmp.eq.s32.totalorder %s813_s23, 1  ;;  %p814_p5 = scmp.ge.s32.totalorder %s1226_s21, 1 }
   0x9   : > { %p1298_p4 = por %p1558_p1, %p42_p0  ;;  %p163_p7 = scmp.lt.s32.totalorder %s1226_s21, 3 }
   0xa   : > { %p1303_p6 = por %p156_p3, %p42_p0  ;;  %s1228_s27 = smov [#allocation5]  }
   0xb   : > { %s1562_s24 = scalar_select %p1298_p4, 1, 0 }
   0xc   : > { %s1563_s25 = scalar_select %p1303_p6, 1, 0 }
   0xd   : > { %p1308_p8 = pnand %p814_p5, %p163_p7  ;;  %s175_s28 = sshll.u32 %s1228_s27, 4  ;;  %s176_s28 = int_to_ptr.vmem [resolvable:$true] %s175_s28 }
   0xe   : > { %s1229_s30 = smov [#allocation7]   ;;  %s1089_s7 = scalar_lea.vmem %s176_s28, 4096 }
   0xf   : > { %s1564_s26 = scalar_select %p1308_p8, 1, 0 }
  0x10   : > { %p1017_p9 = pneg %p1308_p8  ;;  %s191_s6 = sshll.u32 %s1229_s30, 4  ;;  %s192_s6 = int_to_ptr.vmem [resolvable:$true] %s191_s6 }
  0x11   : > { %p1090_p13 = scmp.ne.s32.totalorder %s176_s28, %s1089_s7  ;;  %p1097_p5 = scmp.lt.s32.totalorder %s176_s28, %s176_s28 }
  0x12   : > { %p1317_p11 = pnand %p1017_p9, %p1558_p1  ;;  %p1098_p7 = scmp.lt.s32.totalorder %s1089_s7, %s1089_s7 }
  0x14   : > { %p1080_p12 = pneg %p1317_p11  ;;  %p1099_p10 = por %p1098_p7, %p1097_p5 }
  0x16   : > { %p1092_p0 = pnand %p1090_p13, %p1080_p12 }
  0x18   : > { %p1093_p3 = pneg %p1092_p0 }
  0x1a   : > { %p1100_p9 = pnand %p1099_p10, %p1093_p3 }
  0x1c   : > { %1103 = shalt.err (!%p1100_p9)
}
  0x1d   : > { %s1230_s8 = smov 128   ;;  %s1231_s9 = smov 8  }
  0x1e   : > { %1020 = dma.hbm_to_vmem [thread:$0]  (!%p1317_p11), %s1553_s1, 4096, %s176_s28, [#allocation6], %s1230_s8, %s1230_s8, %s1231_s9  }
  0x1f   : > { %s1115_s12 = scalar_lea.vmem %s192_s6, 2048  ;;  %p1123_p2 = scmp.lt.s32.totalorder %s192_s6, %s192_s6 }
  0x20   : > { %p1116_p1 = scmp.ne.s32.totalorder %s192_s6, %s1115_s12  ;;  %p1124_p6 = scmp.lt.s32.totalorder %s1115_s12, %s1115_s12 }
  0x22   : > { %p1118_p13 = pnand %p1116_p1, %p1080_p12  ;;  %p1125_p5 = por %p1124_p6, %p1123_p2 }
  0x24   : > { %p1119_p0 = pneg %p1118_p13 }
  0x26   : > { %p1126_p10 = pnand %p1125_p5, %p1119_p0 }
  0x28   : > { %1129 = shalt.err (!%p1126_p10)
}
  0x29   : > { %1023 = dma.hbm_to_vmem [thread:$0]  (!%p1317_p11), %s1555_s3, 2048, %s192_s6, [#allocation6], %s1230_s8, %s1230_s8, %s1231_s9  }
  0x2a   : > { %s1340_s15 = sadd.s32 1, %s1226_s21   ;;  %s29_s16 = sadd.s32 1, %s1222_s20 }
  0x2b   : > { %s26_s17 = ssub.s32 %s1226_s21, %s1340_s15  ;;  %p36_p1 = scmp.ne.s32.totalorder %s1222_s20, %s1218_s19 }
  0x2c   : > { %p27_p2 = scmp.eq.s32.totalorder %s26_s17, 0  ;;  %p37_p6 = scmp.eq.s32.totalorder %s1226_s21, 0 }
  0x2d   : > { %p1566_p12 = scmp.eq.s32.totalorder %s1289_s22, 1  ;;  %p1034_p7 = scmp.lt.s32.totalorder %s1226_s21, 2 }
  0x2e   : > { %s1356_s27 = scalar_select %p27_p2, %s1222_s20, %s29_s16  }
  0x2f   : > { %p1350_p3 = por %p1566_p12, %p36_p1  ;;  %p38_p9 = por %p37_p6, %p36_p1 }
  0x30   : > { %s208_s28 = sand.u32 1, %s1222_s20   ;;  %s835_s30 = sshll.u32 %s1226_s21, 12 }
  0x31   : > { %s1567_s23 = scalar_select %p1350_p3, 1, 0 }
  0x32   : > { %s818_s29 = sshll.u32 %s208_s28, 8  ;;  %s1363_s8 = scalar_lea.hbm %s1552_s0, %s835_s30 }
  0x33   : > { %s212_s9 = scalar_lea.vmem [#allocation2], %s818_s29  ;;  %p1367_p11 = pnand %p1034_p7, %p38_p9 }
  0x34   : > { %s220_s10 = sshll.u32 %s212_s9, 4  ;;  %s1371_s12 = scalar_lea.sflag [#allocation3], %s208_s28  ;;  %s1365_s10 = int_to_ptr.vmem [resolvable:$true] %s220_s10 }
  0x35   : > { %s1130_s13 = scalar_lea.hbm %s1363_s8, 4096  ;;  %p1132_p0 = pneg %p1367_p11 }
  0x36   : > { %p1131_p13 = scmp.ne.s32.totalorder %s1363_s8, %s1130_s13  ;;  %s1135_s17 = scalar_lea.hbm %s1552_s0, 8192 }
  0x37   : > { %p1136_p1 = scmp.lt.s32.totalorder %s1363_s8, %s1552_s0  ;;  %p1137_p2 = scmp.lt.s32.totalorder %s1135_s17, %s1130_s13 }
  0x38   : > { %p1133_p5 = pnand %p1132_p0, %p1131_p13 }
  0x39   : > { %p1138_p6 = por %p1137_p2, %p1136_p1 }
  0x3a   : > { %p1134_p10 = pneg %p1133_p5 }
  0x3c   : > { %p1139_p12 = pnand %p1138_p6, %p1134_p10 }
  0x3e   : > { %1142 = shalt.err (!%p1139_p12)
}
  0x3f   : > { %s1143_s28 = scalar_lea.vmem %s1365_s10, 4096  ;;  %s1232_s6 = smov [#allocation2]  }
  0x40   : > { %p1144_p7 = scmp.ne.s32.totalorder %s1365_s10, %s1143_s28  ;;  %s1148_s7 = sshll.u32 %s1232_s6, 4  ;;  %s1149_s7 = int_to_ptr.vmem [resolvable:$false] %s1148_s7 }
  0x41   : > { %s1150_s9 = scalar_lea.vmem %s1149_s7, 8192  ;;  %p1151_p5 = scmp.lt.s32.totalorder %s1365_s10, %s1149_s7 }
  0x42   : > { %p1146_p9 = pnand %p1144_p7, %p1132_p0  ;;  %p1152_p3 = scmp.lt.s32.totalorder %s1150_s9, %s1143_s28 }
  0x44   : > { %p1147_p13 = pneg %p1146_p9  ;;  %p1153_p4 = por %p1152_p3, %p1151_p5 }
  0x46   : > { %p1154_p8 = pnand %p1153_p4, %p1147_p13 }
  0x48   : > { %1157 = shalt.err (!%p1154_p8)
}
  0x49   : > { %s1233_s13 = smov 256   ;;  %s1234_s14 = smov 16  }
  0x4a   : > { %1027 = dma.hbm_to_vmem [thread:$0]  (!%p1367_p11), %s1363_s8, 4096, %s1365_s10, %s1371_s12, %s1233_s13, %s1233_s13, %s1234_s14  }
  0x4b   : > { %p1569_p0 = scmp.ne.s32.totalorder %s1564_s26, 0 }
  0x4c   : > { %s1395_s16 = sand.u32 (!%p1569_p0), 1, %s1218_s19   ;;  %p1570_p4 = scmp.ne.s32.totalorder (!%p1569_p0), %s1562_s24, 0 }
  0x4d   : > { %232 = sbr.rel (%p1569_p0) target bundleno = 593 (0x251), region = 40  ;;  %s823_s17 = sshll.u32 (!%p1569_p0), %s1395_s16, 8 }
  0x4e   : > { %s235_s29 = scalar_lea.sflag (!%p1569_p0), [#allocation3], %s1395_s16  ;;  %s1399_s30 = scalar_lea.vmem (!%p1569_p0), [#allocation2], %s823_s17 }
  0x52   : > { %1201 = dma.done.wait (%p1570_p4), %s235_s29, 4096  }
  0x53   : > { %1203 = vsyncadd (%p1570_p4), %s235_s29, 4294963200  ;;  %p1571_p8 = scmp.eq.s32.totalorder %s1289_s22, 0 }
  0x55   : > { %1205 = dma.done.wait (%p1571_p8), [#allocation6], 6144   ;;  %p1572_p3 = pmov %p1571_p8 }
  0x56   : > { %v338_v0 = vld [vmem:[#allocation5 + $0xf8] sm:$0xff]  ;;  %v337_v2 = vld [vmem:[#allocation5 + $0xf0] sm:$0xff]  ;;  %v336_v4 = vld [vmem:[#allocation5 + $0xe8] sm:$0xff]  ;;  %s826_s11 = sshll.u32 %s1395_s16, 7  ;;  %s836_s28 = sshll.u32 %s1289_s22, 11 }
  0x57   : > { %1207 = vsyncadd (%p1572_p3), [#allocation6], 4294961152  ;;  %v322_v1 = vld [vmem:[#allocation5 + $0x78] sm:$0xff]  ;;  %837 = vmatprep.subr.mxu0 %v338_v0  ;;  %v321_v3 = vld [vmem:[#allocation5 + $0x70] sm:$0xff]  ;;  %s1470_s12 = scalar_lea.vmem [#allocation8], %s826_s11  ;;  %s1505_s13 = scalar_lea.hbm %s1557_s5, %s836_s28 }
  0x58   : > { %838 = vmatpush3.msra.mxu0 %v322_v1  ;;  %v320_v5 = vld [vmem:[#allocation5 + $0x68] sm:$0xff]  ;;  %v335_v6 = vld [vmem:[#allocation5 + $0xe0] sm:$0xff]  ;;  %v334_v8 = vld [vmem:[#allocation5 + $0xd8] sm:$0xff]  ;;  %s721_s6 = sshll.u32 %s1470_s12, 4  ;;  %s708_s14 = scalar_lea.sflag [#allocation4], %s1395_s16  ;;  %s1507_s6 = int_to_ptr.vmem [resolvable:$true] %s721_s6 }
  0x59   : > { %839 = vmatprep.subr.mxu0 %v337_v2  ;;  %v319_v7 = vld [vmem:[#allocation5 + $0x60] sm:$0xff]  ;;  %v318_v9 = vld [vmem:[#allocation5 + $0x58] sm:$0xff]  ;;  %v333_v10 = vld [vmem:[#allocation5 + $0xd0] sm:$0xff]  ;;  %s1158_s22 = scalar_lea.vmem %s1507_s6, 2048  ;;  %p1573_p10 = scmp.ne.s32.totalorder %s1567_s23, 0 }
  0x5a   : > { %840 = vmatpush3.msra.mxu0 %v321_v3  ;;  %v317_v11 = vld [vmem:[#allocation5 + $0x50] sm:$0xff]  ;;  %v332_v12 = vld [vmem:[#allocation5 + $0xc8] sm:$0xff]  ;;  %v331_v15 = vld [vmem:[#allocation5 + $0xc0] sm:$0xff]  ;;  %p1159_p11 = scmp.ne.s32.totalorder %s1507_s6, %s1158_s22  ;;  %s1235_s17 = smov [#allocation8]  }
  0x5b   : > { %841 = vmatprep.subr.mxu0 %v336_v4  ;;  %v276_v13 = vld [vmem:[%s1399_s30 + $0x8] sm:$0xff]  ;;  %v315_v16 = vld [vmem:[#allocation5 + $0x40] sm:$0xff]  ;;  %v330_v17 = vld [vmem:[#allocation5 + $0xb8] sm:$0xff]  ;;  %s1162_s29 = sshll.u32 %s1235_s17, 4  ;;  %s1163_s29 = int_to_ptr.vmem [resolvable:$false] %s1162_s29 }
  0x5c   : > { %842 = vmatpush3.msra.mxu0 %v320_v5  ;;  %v316_v14 = vld [vmem:[#allocation5 + $0x48] sm:$0xff]  ;;  %410 = vmatprep.mubr.f32.mxu0 %v276_v13  ;;  %v314_v18 = vld [vmem:[#allocation5 + $0x38] sm:$0xff]  ;;  %v329_v19 = vld [vmem:[#allocation5 + $0xb0] sm:$0xff]  ;;  %p1160_p1 = pnand %p1159_p11, %p1573_p10  ;;  %p1165_p6 = scmp.lt.s32.totalorder %s1507_s6, %s1163_s29 }
  0x5d   : > { %843 = vmatprep.subr.mxu0 %v335_v6  ;;  %v313_v20 = vld [vmem:[#allocation5 + $0x30] sm:$0xff]  ;;  %v328_v21 = vld [vmem:[#allocation5 + $0xa8] sm:$0xff]  ;;  %v327_v23 = vld [vmem:[#allocation5 + $0xa0] sm:$0xff] }
  0x5e   : > { %844 = vmatpush3.msra.mxu0 %v319_v7  ;;  %v312_v22 = vld [vmem:[#allocation5 + $0x28] sm:$0xff]  ;;  %v311_v24 = vld [vmem:[#allocation5 + $0x20] sm:$0xff]  ;;  %v522_v25 = vld [vmem:[#allocation7 + $0x78] sm:$0xff]  ;;  %p1161_p2 = pneg %p1160_p1 }
  0x5f   : > { %845 = vmatprep.subr.mxu0 %v334_v8  ;;  %v521_v26 = vld [vmem:[#allocation7 + $0x70] sm:$0xff]  ;;  %v326_v27 = vld [vmem:[#allocation5 + $0x98] sm:$0xff]  ;;  %949 = vmatprep.subr.mxu1 %v522_v25  ;;  %v520_v29 = vld [vmem:[#allocation7 + $0x68] sm:$0xff] }
  0x60   : > { %846 = vmatpush3.msra.mxu0 %v318_v9  ;;  %v310_v28 = vld [vmem:[#allocation5 + $0x18] sm:$0xff]  ;;  %950 = vmatpush3.msra.mxu1 %v522_v25  ;;  %v325_v30 = vld [vmem:[#allocation5 + $0x90] sm:$0xff]  ;;  %v519_v32 = vld [vmem:[#allocation7 + $0x60] sm:$0xff] }
  0x61   : > { %847 = vmatprep.subr.mxu0 %v333_v10  ;;  %951 = vmatprep.subr.mxu1 %v521_v26  ;;  %v309_v31 = vld [vmem:[#allocation5 + $0x10] sm:$0xff]  ;;  %v324_v33 = vld [vmem:[#allocation5 + $0x88] sm:$0xff]  ;;  %v518_v35 = vld [vmem:[#allocation7 + $0x58] sm:$0xff] }
  0x62   : > { %848 = vmatpush3.msra.mxu0 %v317_v11  ;;  %952 = vmatpush3.msra.mxu1 %v521_v26  ;;  %v308_v34 = vld [vmem:[#allocation5 + $0x8] sm:$0xff]  ;;  %v323_v36 = vld [vmem:[#allocation5 + $0x80] sm:$0xff]  ;;  %v517_v38 = vld [vmem:[#allocation7 + $0x50] sm:$0xff] }
  0x63   : > { %849 = vmatprep.subr.mxu0 %v332_v12  ;;  %953 = vmatprep.subr.mxu1 %v520_v29  ;;  %v307_v37 = vld [vmem:[#allocation5] sm:$0xff]  ;;  %v278_v40 = vld [vmem:[%s1399_s30 + $0x18] sm:$0xff]  ;;  %v516_v41 = vld [vmem:[#allocation7 + $0x48] sm:$0xff] }
  0x64   : > { %850 = vmatpush3.msra.mxu0 %v316_v14  ;;  %954 = vmatpush3.msra.mxu1 %v520_v29  ;;  %v275_v39 = vld [vmem:[%s1399_s30] sm:$0xff]  ;;  %v277_v43 = vld [vmem:[%s1399_s30 + $0x10] sm:$0xff]  ;;  %v280_v44 = vld [vmem:[%s1399_s30 + $0x28] sm:$0xff] }
  0x65   : > { %851 = vmatprep.subr.mxu0 %v331_v15  ;;  %955 = vmatprep.subr.mxu1 %v519_v32  ;;  %v515_v42 = vld [vmem:[#allocation7 + $0x40] sm:$0xff]  ;;  %v514_v45 = vld [vmem:[#allocation7 + $0x38] sm:$0xff]  ;;  %v513_v46 = vld [vmem:[#allocation7 + $0x30] sm:$0xff] }
  0x66   : > { %852 = vmatpush3.msra.mxu0 %v315_v16  ;;  %956 = vmatpush3.msra.mxu1 %v519_v32  ;;  %v279_v47 = vld [vmem:[%s1399_s30 + $0x20] sm:$0xff]  ;;  %v282_v48 = vld [vmem:[%s1399_s30 + $0x38] sm:$0xff]  ;;  %v281_v49 = vld [vmem:[%s1399_s30 + $0x30] sm:$0xff] }
  0x67   : > { %853 = vmatprep.subr.mxu0 %v330_v17  ;;  %957 = vmatprep.subr.mxu1 %v518_v35  ;;  %v284_v50 = vld [vmem:[%s1399_s30 + $0x48] sm:$0xff]  ;;  %v283_v51 = vld [vmem:[%s1399_s30 + $0x40] sm:$0xff]  ;;  %v286_v52 = vld [vmem:[%s1399_s30 + $0x58] sm:$0xff] }
  0x68   : > { %854 = vmatpush3.msra.mxu0 %v314_v18  ;;  %958 = vmatpush3.msra.mxu1 %v518_v35  ;;  %v285_v53 = vld [vmem:[%s1399_s30 + $0x50] sm:$0xff]  ;;  %v288_v54 = vld [vmem:[%s1399_s30 + $0x68] sm:$0xff]  ;;  %v287_v55 = vld [vmem:[%s1399_s30 + $0x60] sm:$0xff] }
  0x69   : > { %855 = vmatprep.subr.mxu0 %v329_v19  ;;  %959 = vmatprep.subr.mxu1 %v517_v38  ;;  %v290_v56 = vld [vmem:[%s1399_s30 + $0x78] sm:$0xff]  ;;  %v289_v57 = vld [vmem:[%s1399_s30 + $0x70] sm:$0xff]  ;;  %v292_v58 = vld [vmem:[%s1399_s30 + $0x88] sm:$0xff] }
  0x6a   : > { %856 = vmatpush3.msra.mxu0 %v313_v20  ;;  %960 = vmatpush3.msra.mxu1 %v517_v38  ;;  %v291_v59 = vld [vmem:[%s1399_s30 + $0x80] sm:$0xff]  ;;  %v294_v60 = vld [vmem:[%s1399_s30 + $0x98] sm:$0xff]  ;;  %v293_v61 = vld [vmem:[%s1399_s30 + $0x90] sm:$0xff] }
  0x6b   : > { %857 = vmatprep.subr.mxu0 %v328_v21  ;;  %961 = vmatprep.subr.mxu1 %v516_v41  ;;  %v296_v62 = vld [vmem:[%s1399_s30 + $0xa8] sm:$0xff]  ;;  %v295_v63 = vld [vmem:[%s1399_s30 + $0xa0] sm:$0xff]  ;;  %v298_v0 = vld [vmem:[%s1399_s30 + $0xb8] sm:$0xff] }
  0x6c   : > { %858 = vmatpush3.msra.mxu0 %v312_v22  ;;  %962 = vmatpush3.msra.mxu1 %v516_v41  ;;  %v297_v1 = vld [vmem:[%s1399_s30 + $0xb0] sm:$0xff]  ;;  %v300_v2 = vld [vmem:[%s1399_s30 + $0xc8] sm:$0xff]  ;;  %v299_v3 = vld [vmem:[%s1399_s30 + $0xc0] sm:$0xff] }
  0x6d   : > { %859 = vmatprep.subr.mxu0 %v327_v23  ;;  %963 = vmatprep.subr.mxu1 %v515_v42  ;;  %v302_v4 = vld [vmem:[%s1399_s30 + $0xd8] sm:$0xff]  ;;  %v301_v5 = vld [vmem:[%s1399_s30 + $0xd0] sm:$0xff]  ;;  %v304_v6 = vld [vmem:[%s1399_s30 + $0xe8] sm:$0xff] }
  0x6e   : > { %860 = vmatpush3.msra.mxu0 %v311_v24  ;;  %964 = vmatpush3.msra.mxu1 %v515_v42  ;;  %v303_v7 = vld [vmem:[%s1399_s30 + $0xe0] sm:$0xff]  ;;  %v306_v8 = vld [vmem:[%s1399_s30 + $0xf8] sm:$0xff]  ;;  %v305_v9 = vld [vmem:[%s1399_s30 + $0xf0] sm:$0xff]  ;;  %s1164_s30 = scalar_lea.vmem %s1163_s29, 4096 }
  0x6f   : > { %861 = vmatprep.subr.mxu0 %v326_v27  ;;  %965 = vmatprep.subr.mxu1 %v514_v45  ;;  %v512_v10 = vld [vmem:[#allocation7 + $0x28] sm:$0xff]  ;;  %v511_v11 = vld [vmem:[#allocation7 + $0x20] sm:$0xff]  ;;  %v510_v12 = vld [vmem:[#allocation7 + $0x18] sm:$0xff]  ;;  %p1166_p12 = scmp.lt.s32.totalorder %s1164_s30, %s1158_s22 }
  0x70   : > { %862 = vmatpush3.msra.mxu0 %v310_v28  ;;  %966 = vmatpush3.msra.mxu1 %v514_v45  ;;  %v509_v13 = vld [vmem:[#allocation7 + $0x10] sm:$0xff]  ;;  %v508_v14 = vld [vmem:[#allocation7 + $0x8] sm:$0xff]  ;;  %v507_v15 = vld [vmem:[#allocation7] sm:$0xff] }
  0x71   : > { %863 = vmatprep.subr.mxu0 %v325_v30  ;;  %967 = vmatprep.subr.mxu1 %v513_v46  ;;  %v1444_v18 = vld [vmem:[%s1554_s2] ss:$0 sm:$0xff]  ;;  %p1167_p7 = por %p1166_p12, %p1165_p6 }
  0x72   : > { %864 = vmatpush3.msra.mxu0 %v309_v31  ;;  %968 = vmatpush3.msra.mxu1 %v513_v46 }
  0x73   : > { %865 = vmatprep.subr.mxu0 %v324_v33  ;;  %969 = vmatprep.subr.mxu1 %v512_v10  ;;  %p1168_p9 = pnand %p1167_p7, %p1161_p2 }
  0x74   : > { %866 = vmatpush3.msra.mxu0 %v308_v34  ;;  %970 = vmatpush3.msra.mxu1 %v512_v10 }
  0x75   : > { %867 = vmatprep.subr.mxu0 %v323_v36  ;;  %971 = vmatprep.subr.mxu1 %v511_v11 }
  0x76   : > { %868 = vmatpush3.msra.mxu0 %v307_v37  ;;  %972 = vmatpush3.msra.mxu1 %v511_v11 }
  0x77   : > { %411 = vmatmul.mubr.f32.vlgmr.msra.gmra.mxu0 %v275_v39  ;;  %973 = vmatprep.subr.mxu1 %v510_v12 }
  0x78   : > { %415 = vmatprep.mubr.f32.mxu0 %v278_v40  ;;  %974 = vmatpush3.msra.mxu1 %v510_v12 }
  0x79   : > { %975 = vmatprep.subr.mxu1 %v509_v13 }
  0x7a   : > { %976 = vmatpush3.msra.mxu1 %v509_v13 }
  0x7b   : > { %416 = vmatmul.mubr.f32.gmra.mxu0 %v277_v43  ;;  %977 = vmatprep.subr.mxu1 %v508_v14 }
  0x7c   : > { %420 = vmatprep.mubr.f32.mxu0 %v280_v44  ;;  %978 = vmatpush3.msra.mxu1 %v508_v14 }
  0x7d   : > { %979 = vmatprep.subr.mxu1 %v507_v15 }
  0x7e   : > { %980 = vmatpush3.msra.mxu1 %v507_v15 }
  0x7f   : > { %421 = vmatmul.mubr.f32.gmra.mxu0 %v279_v47 }
  0x80   : > { %425 = vmatprep.mubr.f32.mxu0 %v282_v48 }
  0x83   : > { %426 = vmatmul.mubr.f32.gmra.mxu0 %v281_v49 }
  0x84   : > { %430 = vmatprep.mubr.f32.mxu0 %v284_v50 }
  0x87   : > { %431 = vmatmul.mubr.f32.gmra.mxu0 %v283_v51 }
  0x88   : > { %435 = vmatprep.mubr.f32.mxu0 %v286_v52 }
  0x8b   : > { %436 = vmatmul.mubr.f32.gmra.mxu0 %v285_v53 }
  0x8c   : > { %440 = vmatprep.mubr.f32.mxu0 %v288_v54 }
  0x8f   : > { %441 = vmatmul.mubr.f32.gmra.mxu0 %v287_v55 }
  0x90   : > { %445 = vmatprep.mubr.f32.mxu0 %v290_v56 }
  0x93   : > { %446 = vmatmul.mubr.f32.gmra.mxu0 %v289_v57 }
  0x94   : > { %450 = vmatprep.mubr.f32.mxu0 %v292_v58 }
  0x97   : > { %451 = vmatmul.mubr.f32.gmra.mxu0 %v291_v59 }
  0x98   : > { %455 = vmatprep.mubr.f32.mxu0 %v294_v60 }
  0x9b   : > { %456 = vmatmul.mubr.f32.gmra.mxu0 %v293_v61 }
  0x9c   : > { %460 = vmatprep.mubr.f32.mxu0 %v296_v62 }
  0x9f   : > { %461 = vmatmul.mubr.f32.gmra.mxu0 %v295_v63 }
  0xa0   : > { %465 = vmatprep.mubr.f32.mxu0 %v298_v0 }
  0xa3   : > { %466 = vmatmul.mubr.f32.gmra.mxu0 %v297_v1 }
  0xa4   : > { %470 = vmatprep.mubr.f32.mxu0 %v300_v2 }
  0xa7   : > { %471 = vmatmul.mubr.f32.gmra.mxu0 %v299_v3 }
  0xa8   : > { %475 = vmatprep.mubr.f32.mxu0 %v302_v4 }
  0xab   : > { %476 = vmatmul.mubr.f32.gmra.mxu0 %v301_v5 }
  0xac   : > { %480 = vmatprep.mubr.f32.mxu0 %v304_v6 }
  0xaf   : > { %481 = vmatmul.mubr.f32.gmra.mxu0 %v303_v7 }
  0xb0   : > { %485 = vmatprep.mubr.f32.mxu0 %v306_v8 }
  0xb3   : > { %486 = vmatmul.mubr.f32.gmra.mxu0 %v305_v9 }
 0x137   : > { %v869_v16 = vpop.f32.mrf.mxu0 }
 0x139   : > { %v870_v17 = vpop.f32.mrf.mxu0 }
 0x13a   : > { %v871_v19 = vadd.f32 %v870_v17, %v869_v16 }
 0x13b   : > { %v872_v20 = vpop.f32.mrf.mxu0 }
 0x13c   : > { %v413_v21 = vadd.f32 %v871_v19, %v1444_v18 }
 0x13d   : > { %v873_v22 = vpop.f32.mrf.mxu0 }
 0x13e   : > { %v874_v23 = vadd.f32 %v873_v22, %v872_v20  ;;  %v491_v24 = vmax.f32 %v413_v21, 0.0 }
 0x13f   : > { %v875_v25 = vpop.f32.mrf.mxu0 }
 0x140   : > { %v418_v26 = vadd.f32 %v874_v23, %v1444_v18  ;;  %981 = vmatprep.mubr.f32.mxu1 %v491_v24 }
 0x141   : > { %v876_v27 = vpop.f32.mrf.mxu0 }
 0x142   : > { %v492_v28 = vmax.f32 %v418_v26, 0.0  ;;  %v877_v29 = vadd.f32 %v876_v27, %v875_v25 }
 0x143   : > { %v878_v30 = vpop.f32.mrf.mxu0 }
 0x144   : > { %v423_v31 = vadd.f32 %v877_v29, %v1444_v18  ;;  %982 = vmatmul.mubr.f32.vlgmr.msra.gmra.mxu1 %v492_v28 }
 0x145   : > { %v879_v32 = vpop.f32.mrf.mxu0 }
 0x146   : > { %v493_v33 = vmax.f32 %v423_v31, 0.0  ;;  %v880_v34 = vadd.f32 %v879_v32, %v878_v30 }
 0x147   : > { %v881_v35 = vpop.f32.mrf.mxu0 }
 0x148   : > { %v428_v36 = vadd.f32 %v880_v34, %v1444_v18  ;;  %984 = vmatprep.mubr.f32.mxu1 %v493_v33  ;;  %v1465_v34 = vld [vmem:[%s1556_s4] ss:$0 sm:$0xff] }
 0x149   : > { %v882_v37 = vpop.f32.mrf.mxu0 }
 0x14a   : > { %v494_v38 = vmax.f32 %v428_v36, 0.0  ;;  %v883_v39 = vadd.f32 %v882_v37, %v881_v35 }
 0x14b   : > { %v884_v40 = vpop.f32.mrf.mxu0 }
 0x14c   : > { %v433_v41 = vadd.f32 %v883_v39, %v1444_v18  ;;  %985 = vmatmul.mubr.f32.gmra.mxu1 %v494_v38 }
 0x14d   : > { %v885_v42 = vpop.f32.mrf.mxu0 }
 0x14e   : > { %v495_v43 = vmax.f32 %v433_v41, 0.0  ;;  %v886_v44 = vadd.f32 %v885_v42, %v884_v40 }
 0x14f   : > { %v887_v45 = vpop.f32.mrf.mxu0 }
 0x150   : > { %v438_v46 = vadd.f32 %v886_v44, %v1444_v18  ;;  %987 = vmatprep.mubr.f32.mxu1 %v495_v43 }
 0x151   : > { %v888_v47 = vpop.f32.mrf.mxu0 }
 0x152   : > { %v496_v48 = vmax.f32 %v438_v46, 0.0  ;;  %v889_v49 = vadd.f32 %v888_v47, %v887_v45 }
 0x153   : > { %v890_v50 = vpop.f32.mrf.mxu0 }
 0x154   : > { %v443_v51 = vadd.f32 %v889_v49, %v1444_v18  ;;  %988 = vmatmul.mubr.f32.gmra.mxu1 %v496_v48 }
 0x155   : > { %v891_v52 = vpop.f32.mrf.mxu0 }
 0x156   : > { %v497_v53 = vmax.f32 %v443_v51, 0.0  ;;  %v892_v54 = vadd.f32 %v891_v52, %v890_v50 }
 0x157   : > { %v893_v55 = vpop.f32.mrf.mxu0 }
 0x158   : > { %v448_v56 = vadd.f32 %v892_v54, %v1444_v18  ;;  %990 = vmatprep.mubr.f32.mxu1 %v497_v53 }
 0x159   : > { %v894_v57 = vpop.f32.mrf.mxu0 }
 0x15a   : > { %v498_v58 = vmax.f32 %v448_v56, 0.0  ;;  %v895_v59 = vadd.f32 %v894_v57, %v893_v55 }
 0x15b   : > { %v896_v60 = vpop.f32.mrf.mxu0 }
 0x15c   : > { %v453_v61 = vadd.f32 %v895_v59, %v1444_v18  ;;  %991 = vmatmul.mubr.f32.gmra.mxu1 %v498_v58 }
 0x15d   : > { %v897_v62 = vpop.f32.mrf.mxu0 }
 0x15e   : > { %v499_v63 = vmax.f32 %v453_v61, 0.0  ;;  %v898_v0 = vadd.f32 %v897_v62, %v896_v60 }
 0x15f   : > { %v899_v1 = vpop.f32.mrf.mxu0 }
 0x160   : > { %v458_v2 = vadd.f32 %v898_v0, %v1444_v18  ;;  %993 = vmatprep.mubr.f32.mxu1 %v499_v63 }
 0x161   : > { %v900_v3 = vpop.f32.mrf.mxu0 }
 0x162   : > { %v500_v4 = vmax.f32 %v458_v2, 0.0  ;;  %v901_v5 = vadd.f32 %v900_v3, %v899_v1 }
 0x163   : > { %v902_v6 = vpop.f32.mrf.mxu0 }
 0x164   : > { %v463_v7 = vadd.f32 %v901_v5, %v1444_v18  ;;  %994 = vmatmul.mubr.f32.gmra.mxu1 %v500_v4 }
 0x165   : > { %v903_v8 = vpop.f32.mrf.mxu0 }
 0x166   : > { %v501_v9 = vmax.f32 %v463_v7, 0.0  ;;  %v904_v10 = vadd.f32 %v903_v8, %v902_v6 }
 0x167   : > { %v905_v11 = vpop.f32.mrf.mxu0 }
 0x168   : > { %v468_v12 = vadd.f32 %v904_v10, %v1444_v18  ;;  %996 = vmatprep.mubr.f32.mxu1 %v501_v9 }
 0x169   : > { %v906_v13 = vpop.f32.mrf.mxu0 }
 0x16a   : > { %v502_v14 = vmax.f32 %v468_v12, 0.0  ;;  %v907_v15 = vadd.f32 %v906_v13, %v905_v11 }
 0x16b   : > { %v908_v16 = vpop.f32.mrf.mxu0 }
 0x16c   : > { %v473_v17 = vadd.f32 %v907_v15, %v1444_v18  ;;  %997 = vmatmul.mubr.f32.gmra.mxu1 %v502_v14 }
 0x16d   : > { %v909_v19 = vpop.f32.mrf.mxu0 }
 0x16e   : > { %v503_v20 = vmax.f32 %v473_v17, 0.0  ;;  %v910_v21 = vadd.f32 %v909_v19, %v908_v16 }
 0x16f   : > { %v911_v22 = vpop.f32.mrf.mxu0 }
 0x170   : > { %v478_v23 = vadd.f32 %v910_v21, %v1444_v18  ;;  %999 = vmatprep.mubr.f32.mxu1 %v503_v20 }
 0x171   : > { %v912_v24 = vpop.f32.mrf.mxu0 }
 0x172   : > { %v504_v25 = vmax.f32 %v478_v23, 0.0  ;;  %v913_v26 = vadd.f32 %v912_v24, %v911_v22 }
 0x173   : > { %v914_v27 = vpop.f32.mrf.mxu0 }
 0x174   : > { %v483_v28 = vadd.f32 %v913_v26, %v1444_v18  ;;  %1000 = vmatmul.mubr.f32.gmra.mxu1 %v504_v25 }
 0x175   : > { %v915_v29 = vpop.f32.mrf.mxu0 }
 0x176   : > { %v505_v30 = vmax.f32 %v483_v28, 0.0  ;;  %v916_v31 = vadd.f32 %v915_v29, %v914_v27 }
 0x178   : > { %v488_v32 = vadd.f32 %v916_v31, %v1444_v18  ;;  %1002 = vmatprep.mubr.f32.mxu1 %v505_v30 }
 0x17a   : > { %v506_v33 = vmax.f32 %v488_v32, 0.0 }
 0x17c   : > { %1003 = vmatmul.mubr.f32.gmra.mxu1 %v506_v33 }
 0x204   : > { %v983_v35 = vpop.f32.mrf.mxu1 }
 0x205   : > { %v602_v36 = vadd.f32 %v983_v35, %v1465_v34 }
 0x206   : > { %v596_v37 = vpop.f32.mrf.mxu1 }
 0x207   : > { %v676_v38 = vmax.f32 %v602_v36, 0.0  ;;  %v597_v39 = vadd.f32 %v1465_v34, %v596_v37 }
 0x209   : > { %692 = vst [vmem:[%s1470_s12 + $0x8] sm:$0xff] %v676_v38  ;;  %v675_v18 = vmax.f32 %v597_v39, 0.0 }
 0x20b   : > { %691 = vst [vmem:[%s1470_s12] sm:$0xff] %v675_v18 }
 0x20c   : > { %v986_v40 = vpop.f32.mrf.mxu1 }
 0x20d   : > { %v612_v41 = vadd.f32 %v986_v40, %v1465_v34 }
 0x20e   : > { %v606_v42 = vpop.f32.mrf.mxu1 }
 0x20f   : > { %v678_v43 = vmax.f32 %v612_v41, 0.0  ;;  %v607_v44 = vadd.f32 %v1465_v34, %v606_v42 }
 0x211   : > { %694 = vst [vmem:[%s1470_s12 + $0x18] sm:$0xff] %v678_v43  ;;  %v677_v45 = vmax.f32 %v607_v44, 0.0 }
 0x213   : > { %693 = vst [vmem:[%s1470_s12 + $0x10] sm:$0xff] %v677_v45 }
 0x214   : > { %v989_v46 = vpop.f32.mrf.mxu1 }
 0x215   : > { %v622_v47 = vadd.f32 %v989_v46, %v1465_v34 }
 0x216   : > { %v616_v48 = vpop.f32.mrf.mxu1 }
 0x217   : > { %v680_v49 = vmax.f32 %v622_v47, 0.0  ;;  %v617_v50 = vadd.f32 %v1465_v34, %v616_v48 }
 0x219   : > { %696 = vst [vmem:[%s1470_s12 + $0x28] sm:$0xff] %v680_v49  ;;  %v679_v51 = vmax.f32 %v617_v50, 0.0 }
 0x21b   : > { %695 = vst [vmem:[%s1470_s12 + $0x20] sm:$0xff] %v679_v51 }
 0x21c   : > { %v992_v52 = vpop.f32.mrf.mxu1 }
 0x21d   : > { %v632_v53 = vadd.f32 %v992_v52, %v1465_v34 }
 0x21e   : > { %v626_v54 = vpop.f32.mrf.mxu1 }
 0x21f   : > { %v682_v55 = vmax.f32 %v632_v53, 0.0  ;;  %v627_v56 = vadd.f32 %v1465_v34, %v626_v54 }
 0x221   : > { %698 = vst [vmem:[%s1470_s12 + $0x38] sm:$0xff] %v682_v55  ;;  %v681_v57 = vmax.f32 %v627_v56, 0.0 }
 0x223   : > { %697 = vst [vmem:[%s1470_s12 + $0x30] sm:$0xff] %v681_v57 }
 0x224   : > { %v995_v58 = vpop.f32.mrf.mxu1 }
 0x225   : > { %v642_v59 = vadd.f32 %v995_v58, %v1465_v34 }
 0x226   : > { %v636_v60 = vpop.f32.mrf.mxu1 }
 0x227   : > { %v684_v61 = vmax.f32 %v642_v59, 0.0  ;;  %v637_v62 = vadd.f32 %v1465_v34, %v636_v60 }
 0x229   : > { %700 = vst [vmem:[%s1470_s12 + $0x48] sm:$0xff] %v684_v61  ;;  %v683_v63 = vmax.f32 %v637_v62, 0.0 }
 0x22b   : > { %699 = vst [vmem:[%s1470_s12 + $0x40] sm:$0xff] %v683_v63 }
 0x22c   : > { %v998_v0 = vpop.f32.mrf.mxu1 }
 0x22d   : > { %v652_v1 = vadd.f32 %v998_v0, %v1465_v34 }
 0x22e   : > { %v646_v2 = vpop.f32.mrf.mxu1 }
 0x22f   : > { %v686_v3 = vmax.f32 %v652_v1, 0.0  ;;  %v647_v4 = vadd.f32 %v1465_v34, %v646_v2 }
 0x231   : > { %702 = vst [vmem:[%s1470_s12 + $0x58] sm:$0xff] %v686_v3  ;;  %v685_v5 = vmax.f32 %v647_v4, 0.0 }
 0x233   : > { %701 = vst [vmem:[%s1470_s12 + $0x50] sm:$0xff] %v685_v5 }
 0x234   : > { %v1001_v6 = vpop.f32.mrf.mxu1 }
 0x235   : > { %v662_v7 = vadd.f32 %v1001_v6, %v1465_v34 }
 0x236   : > { %v656_v8 = vpop.f32.mrf.mxu1 }
 0x237   : > { %v688_v9 = vmax.f32 %v662_v7, 0.0  ;;  %v657_v10 = vadd.f32 %v1465_v34, %v656_v8 }
 0x239   : > { %704 = vst [vmem:[%s1470_s12 + $0x68] sm:$0xff] %v688_v9  ;;  %v687_v11 = vmax.f32 %v657_v10, 0.0 }
 0x23b   : > { %703 = vst [vmem:[%s1470_s12 + $0x60] sm:$0xff] %v687_v11 }
 0x23c   : > { %v1004_v12 = vpop.f32.mrf.mxu1 }
 0x23d   : > { %v672_v13 = vadd.f32 %v1004_v12, %v1465_v34 }
 0x23e   : > { %v666_v14 = vpop.f32.mrf.mxu1 }
 0x23f   : > { %v690_v15 = vmax.f32 %v672_v13, 0.0  ;;  %v667_v16 = vadd.f32 %v1465_v34, %v666_v14 }
 0x241   : > { %706 = vst [vmem:[%s1470_s12 + $0x78] sm:$0xff] %v690_v15  ;;  %v689_v17 = vmax.f32 %v667_v16, 0.0 }
 0x243   : > { %705 = vst [vmem:[%s1470_s12 + $0x70] sm:$0xff] %v689_v17 }
 0x244   : > { %1171 = shalt.err (!%p1168_p9)
}
 0x245   : > { %s1172_s24 = scalar_lea.hbm %s1505_s13, 2048  ;;  %s1176_s10 = scalar_lea.hbm %s1557_s5, 4096 }
 0x246   : > { %p1173_p13 = scmp.ne.s32.totalorder %s1505_s13, %s1172_s24  ;;  %p1177_p4 = scmp.lt.s32.totalorder %s1505_s13, %s1557_s5 }
 0x247   : > { %p1178_p8 = scmp.lt.s32.totalorder %s1176_s10, %s1172_s24 }
 0x248   : > { %p1174_p5 = pnand %p1173_p13, %p1573_p10 }
 0x249   : > { %p1179_p3 = por %p1178_p8, %p1177_p4 }
 0x24a   : > { %p1175_p0 = pneg %p1174_p5 }
 0x24c   : > { %p1180_p11 = pnand %p1179_p3, %p1175_p0 }
 0x24e   : > { %1183 = shalt.err (!%p1180_p11)
}
 0x24f   : > { %s1236_s28 = smov 128   ;;  %s1237_s7 = smov 8  }
 0x250   : > { %1015 = dma.vmem_to_hbm [thread:$0]  (%p1573_p10), %s1507_s6, 2048, %s1505_s13, %s708_s14, %s1236_s28, %s1236_s28, %s1237_s7  }
 0x251 PF: > { %s736_s9 = sand.u32 1, %s1214_s18   ;;  %p1574_p1 = scmp.ne.s32.totalorder %s1563_s25, 0 }
 0x252   : > { %p1575_p2 = scmp.ge.s32.totalorder %s1226_s21, 2  ;;  %s737_s22 = scalar_lea.sflag [#allocation4], %s736_s9 }
 0x254   : > { %p1029_p6 = pnand %p1575_p2, %p1574_p1 }
 0x256   : > { %p1030_p12 = pneg %p1029_p6 }
 0x258   : > { %1209 = dma.done.wait (%p1030_p12), %s737_s22, 2048  }
 0x259   : > { %1211 = vsyncadd (%p1030_p12), %s737_s22, 4294965248  ;;  %p19_p7 = scmp.ge.s32.totalorder %s1340_s15, 4   ;;  %s1576_s18 = smov %s1218_s19 }
 0x25a   : > { %s1577_s19 = smov %s1222_s20  ;;  %s1578_s20 = smov %s1356_s27 }
 0x25b   : > { %s1579_s21 = smov %s1340_s15  ;;  %21 = sbr.rel (!%p19_p7) target bundleno = 6 (0x6), region = 93 }
 0x260   :  { %742 = vsyncpa [#allocation3], 1 }
 0x261   :  { %744 = vsyncpa [#allocation3 + $0x1], 1 }
 0x262   :  { %745 = vsyncpa [#allocation6], 1 }
 0x263   :  { %746 = vsyncpa [#allocation4], 1 }
 0x264   :  { %748 = vsyncpa [#allocation4 + $0x1], 1 }

</bundles_post_ra>
